<compile_context>
chip_gen: v7x
topology: tpu7x:2x2x1
jax: 0.10.0
libtpu: 0.0.40
codegen_flags: <defaults>
</compile_context>

<pallas_src>
import functools

import jax
import jax.numpy as jnp
from jax import lax
from jax.experimental import pallas as pl
from jax.experimental.pallas import tpu as pltpu

EPS = 1e-5


# ----------------------------- Pallas kernels -----------------------------

def _shuffle_block_s1_kernel(x_ref, w1_ref, b1_ref, wdw_ref, bdw_ref,
                             w2_ref, b2_ref, o_ref, y1p_ref, *, C, H, W):
    """Fused stride-1 block: passthrough + (pw1 -> dw3x3 -> pw2) + shuffle.

    x_ref:   (1, C, H, W) VMEM      o_ref: (1, C, H, W) VMEM
    weights: flattened f32 arrays in SMEM (scalar-broadcast FMAs on the VPU)
    y1p_ref: (C//2, H+2, W+2) VMEM scratch -- pw1 output with its zero halo.
    """
    Cb = C // 2

    # --- branch2 stage 1: 1x1 conv + folded BN + ReLU, into padded scratch ---
    y1p_ref[...] = jnp.zeros_like(y1p_ref)           # zero halo for the dw conv
    for co in range(Cb):
        acc = jnp.zeros((H, W), jnp.float32)
        for ci in range(Cb):
            acc = acc + w1_ref[co * Cb + ci] * x_ref[0, Cb + ci]
        y1p_ref[co, 1:1 + H, 1:1 + W] = jnp.maximum(acc + b1_ref[co], 0.0)

    # --- branch2 stage 2: 3x3 depthwise conv (stride 1) from padded scratch ---
    z = []
    for c in range(Cb):
        acc = jnp.zeros((H, W), jnp.float32)
        for di in range(3):
            for dj in range(3):
                acc = acc + wdw_ref[(di * 3 + dj) * Cb + c] * \
                    y1p_ref[c, di:di + H, dj:dj + W]
        z.append(acc + bdw_ref[c])

    # --- branch2 stage 3 + passthrough, written with the channel shuffle ---
    for co in range(Cb):
        acc = jnp.zeros((H, W), jnp.float32)
        for ci in range(Cb):
            acc = acc + w2_ref[co * Cb + ci] * z[ci]
        o_ref[0, 2 * co + 1] = jnp.maximum(acc + b2_ref[co], 0.0)  # branch2 -> odd
        o_ref[0, 2 * co] = x_ref[0, co]                            # passthrough -> even


def _shuffle_block_s2_kernel(xph_ref,
                             wdw1_ref, bdw1_ref, w11_ref, b11_ref,
                             w21_ref, b21_ref, wdw2_ref, bdw2_ref,
                             w22_ref, b22_ref,
                             o_ref, y1ph_ref, *, C, Cb, Ho, Wo):
    """Fused stride-2 block: branch1 + branch2 + shuffle, at output resolution.

    xph_ref:  (1, 4*C, P, P) VMEM -- 2x2 phases of the zero-padded input,
              phase p = 2*(row parity) + (col parity), channel c at p*C + c.
    y1ph_ref: (4*Cb, P, P) VMEM scratch -- phases of padded relu(pw1(x)).
    The depthwise stride-2 conv then needs only unit-stride slices:
        out[io,jo] = sum_{di,dj} w[di,dj] * phase[di%2,dj%2][io+di//2, jo+dj//2]
    """
    P = Ho + 1

    # ---------------- branch1: dw3x3 (stride 2) -> pw1x1 + ReLU ----------------
    z1 = []
    for c in range(C):
        acc = jnp.zeros((Ho, Wo), jnp.float32)
        for di in range(3):
            for dj in range(3):
                p = 2 * (di % 2) + (dj % 2)
                ka, kb = di // 2, dj // 2
                acc = acc + wdw1_ref[(di * 3 + dj) * C + c] * \
                    xph_ref[0, p * C + c, ka:ka + Ho, kb:kb + Wo]
        z1.append(acc + bdw1_ref[c])
    for co in range(Cb):
        acc = jnp.zeros((Ho, Wo), jnp.float32)
        for ci in range(C):
            acc = acc + w11_ref[co * C + ci] * z1[ci]
        o_ref[0, 2 * co] = jnp.maximum(acc + b11_ref[co], 0.0)     # branch1 -> even

    # ---------------- branch2: pw1x1 + ReLU (per phase, halo kept zero) --------
    y1ph_ref[...] = jnp.zeros_like(y1ph_ref)
    for p, (a, b) in enumerate(((0, 0), (0, 1), (1, 0), (1, 1))):
        rs = slice(1, P) if a == 0 else slice(0, P - 1)   # skip the zero-pad row
        cs = slice(1, P) if b == 0 else slice(0, P - 1)   # skip the zero-pad col
        for co in range(Cb):
            acc = jnp.zeros((P - 1, P - 1), jnp.float32)
            for ci in range(C):
                acc = acc + w21_ref[co * C + ci] * xph_ref[0, p * C + ci, rs, cs]
            y1ph_ref[p * Cb + co, rs, cs] = jnp.maximum(acc + b21_ref[co], 0.0)

    # ---------------- branch2: dw3x3 (stride 2) -> pw1x1 + ReLU ----------------
    z2 = []
    for c in range(Cb):
        acc = jnp.zeros((Ho, Wo), jnp.float32)
        for di in range(3):
            for dj in range(3):
                p = 2 * (di % 2) + (dj % 2)
                ka, kb = di // 2, dj // 2
                acc = acc + wdw2_ref[(di * 3 + dj) * Cb + c] * \
                    y1ph_ref[p * Cb + c, ka:ka + Ho, kb:kb + Wo]
        z2.append(acc + bdw2_ref[c])
    for co in range(Cb):
        acc = jnp.zeros((Ho, Wo), jnp.float32)
        for ci in range(Cb):
            acc = acc + w22_ref[co * Cb + ci] * z2[ci]
        o_ref[0, 2 * co + 1] = jnp.maximum(acc + b22_ref[co], 0.0)  # branch2 -> odd


# ----------------------------- Wrappers (glue) -----------------------------

def _smem():
    return pl.BlockSpec(memory_space=pltpu.MemorySpace.SMEM)


def _flat_pw(w):
    # (Cin, Cout) -> flat, indexed as [co * Cin + ci]
    return jnp.transpose(w).reshape(-1)


def shuffle_block_forward(x_nchw, params, stride):
    """ShuffleBlock forward. Input/output in NCHW (PyTorch convention)."""
    N, C, H, W = x_nchw.shape

    if stride == 1:
        Cb = C // 2
        p2 = params["branch2"]
        return pl.pallas_call(
            functools.partial(_shuffle_block_s1_kernel, C=C, H=H, W=W),
            out_shape=jax.ShapeDtypeStruct((N, C, H, W), jnp.float32),
            grid=(N,),
            in_specs=[pl.BlockSpec((1, C, H, W), lambda n: (n, 0, 0, 0))]
                     + [_smem()] * 6,
            out_specs=pl.BlockSpec((1, C, H, W), lambda n: (n, 0, 0, 0)),
            scratch_shapes=[pltpu.VMEM((Cb, H + 2, W + 2), jnp.float32)],
            compiler_params=pltpu.CompilerParams(
                dimension_semantics=("parallel",)),
        )(x_nchw,
          _flat_pw(p2["w1"]), p2["b1"],
          p2["wdw"].reshape(-1), p2["bdw"],
          _flat_pw(p2["w2"]), p2["b2"])

    # ----- stride == 2 -----
    assert H % 2 == 0 and W % 2 == 0
    p1, p2 = params["branch1"], params["branch2"]
    Cb = p2["w1"].shape[1]
    Ho, Wo = H // 2, W // 2
    P = Ho + 1

    # Cheap XLA glue: pad once, split the padded input into its 2x2 phases so
    # the kernel only ever uses unit-stride slices (stride-2 computed directly).
    xp = jnp.pad(x_nchw, ((0, 0), (0, 0), (1, 1), (1, 1)))
    phases = [xp[:, :, a::2, b::2] for a in (0, 1) for b in (0, 1)]
    xph = jnp.stack(phases, axis=1).reshape(N, 4 * C, P, P)

    return pl.pallas_call(
        functools.partial(_shuffle_block_s2_kernel, C=C, Cb=Cb, Ho=Ho, Wo=Wo),
        out_shape=jax.ShapeDtypeStruct((N, 2 * Cb, Ho, Wo), jnp.float32),
        grid=(N,),
        in_specs=[pl.BlockSpec((1, 4 * C, P, P), lambda n: (n, 0, 0, 0))]
                 + [_smem()] * 10,
        out_specs=pl.BlockSpec((1, 2 * Cb, Ho, Wo), lambda n: (n, 0, 0, 0)),
        scratch_shapes=[pltpu.VMEM((4 * Cb, P, P), jnp.float32)],
        compiler_params=pltpu.CompilerParams(
            dimension_semantics=("parallel",)),
    )(xph,
      p1["wdw"].reshape(-1), p1["bdw"], _flat_pw(p1["w1"]), p1["b1"],
      _flat_pw(p2["w1"]), p2["b1"], p2["wdw"].reshape(-1), p2["bdw"],
      _flat_pw(p2["w2"]), p2["b2"])


# ----------------------------- Parameter init -----------------------------

def _bn_params(key, c):
    k1, k2, k3, k4 = jax.random.split(key, 4)
    gamma = jax.random.uniform(k1, (c,), jnp.float32, 0.5, 1.5)
    beta = 0.1 * jax.random.normal(k2, (c,), jnp.float32)
    mean = 0.1 * jax.random.normal(k3, (c,), jnp.float32)
    var = jax.random.uniform(k4, (c,), jnp.float32, 0.5, 1.5)
    return gamma, beta, mean, var


def _fold(gamma, beta, mean, var, conv_bias=None):
    scale = gamma / jnp.sqrt(var + EPS)
    shift = beta - mean * scale
    if conv_bias is not None:
        shift = shift + conv_bias * scale
    return scale, shift


def _pw_conv_bn(key, cin, cout):
    kw, kb = jax.random.split(key)
    w = 0.1 * jax.random.normal(kw, (cin, cout), jnp.float32)   # 1x1 conv, no bias
    gamma, beta, mean, var = _bn_params(kb, cout)
    scale, shift = _fold(gamma, beta, mean, var)
    return w * scale[None, :], shift


def _dw_conv_bn(key, c):
    kw, kbias, kb = jax.random.split(key, 3)
    w = 0.1 * jax.random.normal(kw, (3, 3, c), jnp.float32)     # depthwise 3x3, has bias
    b = 0.1 * jax.random.normal(kbias, (c,), jnp.float32)
    gamma, beta, mean, var = _bn_params(kb, c)
    scale, shift = _fold(gamma, beta, mean, var, conv_bias=b)
    return w * scale, shift


def init_params(key, in_ch, out_ch, stride):
    bf = out_ch // 2
    params = {}
    if stride > 1:
        k1, k2, k3, k4, k5 = jax.random.split(key, 5)
        wdw, bdw = _dw_conv_bn(k1, in_ch)
        w1, b1 = _pw_conv_bn(k2, in_ch, bf)
        params["branch1"] = dict(wdw=wdw, bdw=bdw, w1=w1, b1=b1)
        wb1, bb1 = _pw_conv_bn(k3, in_ch, bf)
        wbdw, bbdw = _dw_conv_bn(k4, bf)
        wb2, bb2 = _pw_conv_bn(k5, bf, bf)
        params["branch2"] = dict(w1=wb1, b1=bb1, wdw=wbdw, bdw=bbdw, w2=wb2, b2=bb2)
    else:
        k3, k4, k5 = jax.random.split(key, 3)
        wb1, bb1 = _pw_conv_bn(k3, bf, bf)
        wbdw, bbdw = _dw_conv_bn(k4, bf)
        wb2, bb2 = _pw_conv_bn(k5, bf, bf)
        params["branch2"] = dict(w1=wb1, b1=bb1, wdw=wbdw, bdw=bbdw, w2=wb2, b2=bb2)
    return params


# ----------------------------- Pure-JAX reference -----------------------------

def channel_shuffle_nhwc(x, groups):
    N, H, W, C = x.shape
    x = x.reshape(N, H, W, groups, C // groups)
    x = jnp.transpose(x, (0, 1, 2, 4, 3))
    return x.reshape(N, H, W, C)


def _ref_pointwise(x, w, b, relu):
    y = lax.conv_general_dilated(
        x, w[None, None, :, :], (1, 1), "VALID",
        dimension_numbers=("NHWC", "HWIO", "NHWC")) + b
    return jnp.maximum(y, 0.0) if relu else y


def _ref_depthwise(x, w, b, stride):
    C = x.shape[-1]
    y = lax.conv_general_dilated(
        x, w[:, :, None, :], (stride, stride), ((1, 1), (1, 1)),
        dimension_numbers=("NHWC", "HWIO", "NHWC"),
        feature_group_count=C)
    return y + b


def reference_forward(x_nchw, params, stride):
    x = jnp.transpose(x_nchw, (0, 2, 3, 1))

    def b2(z, p):
        z = _ref_pointwise(z, p["w1"], p["b1"], True)
        z = _ref_depthwise(z, p["wdw"], p["bdw"], stride)
        return _ref_pointwise(z, p["w2"], p["b2"], True)

    if stride == 1:
        C = x.shape[-1]
        out = jnp.concatenate(
            [x[..., : C // 2], b2(x[..., C // 2:], params["branch2"])], axis=-1)
    else:
        p1 = params["branch1"]
        z1 = _ref_depthwise(x, p1["wdw"], p1["bdw"], stride)
        z1 = _ref_pointwise(z1, p1["w1"], p1["b1"], True)
        out = jnp.concatenate([z1, b2(x, params["branch2"])], axis=-1)
    out = channel_shuffle_nhwc(out, 2)
    return jnp.transpose(out, (0, 3, 1, 2))


# ----------------------------- Main -----------------------------

if __name__ == "__main__":
    key = jax.random.PRNGKey(0)
    kx, kp1, kp2 = jax.random.split(key, 3)

    # NCHW input like the PyTorch module.
    x = jax.random.normal(kx, (2, 4, 16, 16), jnp.float32)

    # stride = 1 block: in_ch == out_ch == 4
    params_s1 = init_params(kp1, in_ch=4, out_ch=4, stride=1)
    out_s1 = shuffle_block_forward(x, params_s1, stride=1)
    jax.block_until_ready(out_s1)
    ref_s1 = reference_forward(x, params_s1, stride=1)
    assert out_s1.shape == (2, 4, 16, 16)
    assert bool(jnp.allclose(out_s1, ref_s1, atol=1e-4, rtol=1e-4))

    # stride = 2 block: in_ch=4 -> out_ch=8, spatial halved
    params_s2 = init_params(kp2, in_ch=4, out_ch=8, stride=2)
    out_s2 = shuffle_block_forward(x, params_s2, stride=2)
    jax.block_until_ready(out_s2)
    ref_s2 = reference_forward(x, params_s2, stride=2)
    assert out_s2.shape == (2, 8, 8, 8)
    assert bool(jnp.allclose(out_s2, ref_s2, atol=1e-4, rtol=1e-4))

    print("KERNEL_OK")
</pallas_src>

<mosaic_0001>
module attributes {stable_mosaic.version = 11 : i64} {
  func.func @_shuffle_block_s1_kernel(%arg0: i32, %arg1: memref<1x4x16x16xf32, #tpu.memory_space<vmem>>, %arg2: memref<4xf32, #tpu.memory_space<smem>>, %arg3: memref<2xf32, #tpu.memory_space<smem>>, %arg4: memref<18xf32, #tpu.memory_space<smem>>, %arg5: memref<2xf32, #tpu.memory_space<smem>>, %arg6: memref<4xf32, #tpu.memory_space<smem>>, %arg7: memref<2xf32, #tpu.memory_space<smem>>, %arg8: memref<1x4x16x16xf32, #tpu.memory_space<vmem>>, %arg9: memref<2x18x18xf32, #tpu.memory_space<vmem>>) attributes {dimension_semantics = [#tpu.dimension_semantics<parallel>], iteration_bounds = array<i64: 2>, scalar_prefetch = 0 : i64, scratch_operands = 1 : i64, tpu.core_type = #tpu.core_type<tc>, window_params = [{transform_indices = @transform_0, window_bounds = array<i64: 1, 4, 16, 16>}, {transform_indices = @transform_1, window_bounds = array<i64: 4>}, {transform_indices = @transform_2, window_bounds = array<i64: 2>}, {transform_indices = @transform_3, window_bounds = array<i64: 18>}, {transform_indices = @transform_4, window_bounds = array<i64: 2>}, {transform_indices = @transform_5, window_bounds = array<i64: 4>}, {transform_indices = @transform_6, window_bounds = array<i64: 2>}, {transform_indices = @transform_7, window_bounds = array<i64: 1, 4, 16, 16>}]} {
    %cst = arith.constant 0.000000e+00 : f32
    %0 = vector.broadcast %cst : f32 to vector<2x18x18xf32>
    %c0 = arith.constant 0 : index
    %c0_0 = arith.constant 0 : index
    %c0_1 = arith.constant 0 : index
    %1 = vector.load %arg9[%c0, %c0_0, %c0_1] : memref<2x18x18xf32, #tpu.memory_space<vmem>>, vector<2x18x18xf32>
    tpu.vector_store %arg9[%c0, %c0_0, %c0_1], %0 {strides = array<i32>} : memref<2x18x18xf32, #tpu.memory_space<vmem>>, vector<2x18x18xf32>,
    %cst_2 = arith.constant 0.000000e+00 : f32
    %2 = vector.broadcast %cst_2 : f32 to vector<16x16xf32>
    %c0_3 = arith.constant 0 : index
    %3 = memref.load %arg2[%c0_3] : memref<4xf32, #tpu.memory_space<smem>>
    %c0_4 = arith.constant 0 : index
    %c2 = arith.constant 2 : index
    %c0_5 = arith.constant 0 : index
    %c0_6 = arith.constant 0 : index
    %4 = vector.load %arg1[%c0_4, %c2, %c0_5, %c0_6] : memref<1x4x16x16xf32, #tpu.memory_space<vmem>>, vector<1x1x16x16xf32>
    %5 = vector.shape_cast %4 : vector<1x1x16x16xf32> to vector<16x16xf32>
    %6 = vector.broadcast %3 : f32 to vector<16x16xf32>
    %7 = arith.mulf %6, %5 : vector<16x16xf32>
    %8 = arith.addf %2, %7 : vector<16x16xf32>
    %c1 = arith.constant 1 : index
    %9 = memref.load %arg2[%c1] : memref<4xf32, #tpu.memory_space<smem>>
    %c0_7 = arith.constant 0 : index
    %c3 = arith.constant 3 : index
    %c0_8 = arith.constant 0 : index
    %c0_9 = arith.constant 0 : index
    %10 = vector.load %arg1[%c0_7, %c3, %c0_8, %c0_9] : memref<1x4x16x16xf32, #tpu.memory_space<vmem>>, vector<1x1x16x16xf32>
    %11 = vector.shape_cast %10 : vector<1x1x16x16xf32> to vector<16x16xf32>
    %12 = vector.broadcast %9 : f32 to vector<16x16xf32>
    %13 = arith.mulf %12, %11 : vector<16x16xf32>
    %14 = arith.addf %8, %13 : vector<16x16xf32>
    %c0_10 = arith.constant 0 : index
    %15 = memref.load %arg3[%c0_10] : memref<2xf32, #tpu.memory_space<smem>>
    %16 = vector.broadcast %15 : f32 to vector<16x16xf32>
    %17 = arith.addf %14, %16 : vector<16x16xf32>
    %cst_11 = arith.constant 0.000000e+00 : f32
    %18 = vector.broadcast %cst_11 : f32 to vector<16x16xf32>
    %19 = arith.maximumf %17, %18 : vector<16x16xf32>
    %c0_12 = arith.constant 0 : index
    %c1_13 = arith.constant 1 : index
    %c1_14 = arith.constant 1 : index
    %20 = vector.load %arg9[%c0_12, %c1_13, %c1_14] : memref<2x18x18xf32, #tpu.memory_space<vmem>>, vector<1x16x16xf32>
    %21 = vector.shape_cast %20 : vector<1x16x16xf32> to vector<16x16xf32>
    %22 = vector.shape_cast %19 : vector<16x16xf32> to vector<1x16x16xf32>
    tpu.vector_store %arg9[%c0_12, %c1_13, %c1_14], %22 {strides = array<i32>} : memref<2x18x18xf32, #tpu.memory_space<vmem>>, vector<1x16x16xf32>,
    %cst_15 = arith.constant 0.000000e+00 : f32
    %23 = vector.broadcast %cst_15 : f32 to vector<16x16xf32>
    %c2_16 = arith.constant 2 : index
    %24 = memref.load %arg2[%c2_16] : memref<4xf32, #tpu.memory_space<smem>>
    %c0_17 = arith.constant 0 : index
    %c2_18 = arith.constant 2 : index
    %c0_19 = arith.constant 0 : index
    %c0_20 = arith.constant 0 : index
    %25 = vector.load %arg1[%c0_17, %c2_18, %c0_19, %c0_20] : memref<1x4x16x16xf32, #tpu.memory_space<vmem>>, vector<1x1x16x16xf32>
    %26 = vector.shape_cast %25 : vector<1x1x16x16xf32> to vector<16x16xf32>
    %27 = vector.broadcast %24 : f32 to vector<16x16xf32>
    %28 = arith.mulf %27, %26 : vector<16x16xf32>
    %29 = arith.addf %23, %28 : vector<16x16xf32>
    %c3_21 = arith.constant 3 : index
    %30 = memref.load %arg2[%c3_21] : memref<4xf32, #tpu.memory_space<smem>>
    %c0_22 = arith.constant 0 : index
    %c3_23 = arith.constant 3 : index
    %c0_24 = arith.constant 0 : index
    %c0_25 = arith.constant 0 : index
    %31 = vector.load %arg1[%c0_22, %c3_23, %c0_24, %c0_25] : memref<1x4x16x16xf32, #tpu.memory_space<vmem>>, vector<1x1x16x16xf32>
    %32 = vector.shape_cast %31 : vector<1x1x16x16xf32> to vector<16x16xf32>
    %33 = vector.broadcast %30 : f32 to vector<16x16xf32>
    %34 = arith.mulf %33, %32 : vector<16x16xf32>
    %35 = arith.addf %29, %34 : vector<16x16xf32>
    %c1_26 = arith.constant 1 : index
    %36 = memref.load %arg3[%c1_26] : memref<2xf32, #tpu.memory_space<smem>>
    %37 = vector.broadcast %36 : f32 to vector<16x16xf32>
    %38 = arith.addf %35, %37 : vector<16x16xf32>
    %cst_27 = arith.constant 0.000000e+00 : f32
    %39 = vector.broadcast %cst_27 : f32 to vector<16x16xf32>
    %40 = arith.maximumf %38, %39 : vector<16x16xf32>
    %c1_28 = arith.constant 1 : index
    %c1_29 = arith.constant 1 : index
    %c1_30 = arith.constant 1 : index
    %41 = vector.load %arg9[%c1_28, %c1_29, %c1_30] : memref<2x18x18xf32, #tpu.memory_space<vmem>>, vector<1x16x16xf32>
    %42 = vector.shape_cast %41 : vector<1x16x16xf32> to vector<16x16xf32>
    %43 = vector.shape_cast %40 : vector<16x16xf32> to vector<1x16x16xf32>
    tpu.vector_store %arg9[%c1_28, %c1_29, %c1_30], %43 {strides = array<i32>} : memref<2x18x18xf32, #tpu.memory_space<vmem>>, vector<1x16x16xf32>,
    %cst_31 = arith.constant 0.000000e+00 : f32
    %44 = vector.broadcast %cst_31 : f32 to vector<16x16xf32>
    %c0_32 = arith.constant 0 : index
    %45 = memref.load %arg4[%c0_32] : memref<18xf32, #tpu.memory_space<smem>>
    %c0_33 = arith.constant 0 : index
    %c0_34 = arith.constant 0 : index
    %c0_35 = arith.constant 0 : index
    %46 = vector.load %arg9[%c0_33, %c0_34, %c0_35] : memref<2x18x18xf32, #tpu.memory_space<vmem>>, vector<1x16x16xf32>
    %47 = vector.shape_cast %46 : vector<1x16x16xf32> to vector<16x16xf32>
    %48 = vector.broadcast %45 : f32 to vector<16x16xf32>
    %49 = arith.mulf %48, %47 : vector<16x16xf32>
    %50 = arith.addf %44, %49 : vector<16x16xf32>
    %c2_36 = arith.constant 2 : index
    %51 = memref.load %arg4[%c2_36] : memref<18xf32, #tpu.memory_space<smem>>
    %c0_37 = arith.constant 0 : index
    %c0_38 = arith.constant 0 : index
    %c1_39 = arith.constant 1 : index
    %52 = vector.load %arg9[%c0_37, %c0_38, %c1_39] : memref<2x18x18xf32, #tpu.memory_space<vmem>>, vector<1x16x16xf32>
    %53 = vector.shape_cast %52 : vector<1x16x16xf32> to vector<16x16xf32>
    %54 = vector.broadcast %51 : f32 to vector<16x16xf32>
    %55 = arith.mulf %54, %53 : vector<16x16xf32>
    %56 = arith.addf %50, %55 : vector<16x16xf32>
    %c4 = arith.constant 4 : index
    %57 = memref.load %arg4[%c4] : memref<18xf32, #tpu.memory_space<smem>>
    %c0_40 = arith.constant 0 : index
    %c0_41 = arith.constant 0 : index
    %c2_42 = arith.constant 2 : index
    %58 = vector.load %arg9[%c0_40, %c0_41, %c2_42] : memref<2x18x18xf32, #tpu.memory_space<vmem>>, vector<1x16x16xf32>
    %59 = vector.shape_cast %58 : vector<1x16x16xf32> to vector<16x16xf32>
    %60 = vector.broadcast %57 : f32 to vector<16x16xf32>
    %61 = arith.mulf %60, %59 : vector<16x16xf32>
    %62 = arith.addf %56, %61 : vector<16x16xf32>
    %c6 = arith.constant 6 : index
    %63 = memref.load %arg4[%c6] : memref<18xf32, #tpu.memory_space<smem>>
    %c0_43 = arith.constant 0 : index
    %c1_44 = arith.constant 1 : index
    %c0_45 = arith.constant 0 : index
    %64 = vector.load %arg9[%c0_43, %c1_44, %c0_45] : memref<2x18x18xf32, #tpu.memory_space<vmem>>, vector<1x16x16xf32>
    %65 = vector.shape_cast %64 : vector<1x16x16xf32> to vector<16x16xf32>
    %66 = vector.broadcast %63 : f32 to vector<16x16xf32>
    %67 = arith.mulf %66, %65 : vector<16x16xf32>
    %68 = arith.addf %62, %67 : vector<16x16xf32>
    %c8 = arith.constant 8 : index
    %69 = memref.load %arg4[%c8] : memref<18xf32, #tpu.memory_space<smem>>
    %c0_46 = arith.constant 0 : index
    %c1_47 = arith.constant 1 : index
    %c1_48 = arith.constant 1 : index
    %70 = vector.load %arg9[%c0_46, %c1_47, %c1_48] : memref<2x18x18xf32, #tpu.memory_space<vmem>>, vector<1x16x16xf32>
    %71 = vector.shape_cast %70 : vector<1x16x16xf32> to vector<16x16xf32>
    %72 = vector.broadcast %69 : f32 to vector<16x16xf32>
    %73 = arith.mulf %72, %71 : vector<16x16xf32>
    %74 = arith.addf %68, %73 : vector<16x16xf32>
    %c10 = arith.constant 10 : index
    %75 = memref.load %arg4[%c10] : memref<18xf32, #tpu.memory_space<smem>>
    %c0_49 = arith.constant 0 : index
    %c1_50 = arith.constant 1 : index
    %c2_51 = arith.constant 2 : index
    %76 = vector.load %arg9[%c0_49, %c1_50, %c2_51] : memref<2x18x18xf32, #tpu.memory_space<vmem>>, vector<1x16x16xf32>
    %77 = vector.shape_cast %76 : vector<1x16x16xf32> to vector<16x16xf32>
    %78 = vector.broadcast %75 : f32 to vector<16x16xf32>
    %79 = arith.mulf %78, %77 : vector<16x16xf32>
    %80 = arith.addf %74, %79 : vector<16x16xf32>
    %c12 = arith.constant 12 : index
    %81 = memref.load %arg4[%c12] : memref<18xf32, #tpu.memory_space<smem>>
    %c0_52 = arith.constant 0 : index
    %c2_53 = arith.constant 2 : index
    %c0_54 = arith.constant 0 : index
    %82 = vector.load %arg9[%c0_52, %c2_53, %c0_54] : memref<2x18x18xf32, #tpu.memory_space<vmem>>, vector<1x16x16xf32>
    %83 = vector.shape_cast %82 : vector<1x16x16xf32> to vector<16x16xf32>
    %84 = vector.broadcast %81 : f32 to vector<16x16xf32>
    %85 = arith.mulf %84, %83 : vector<16x16xf32>
    %86 = arith.addf %80, %85 : vector<16x16xf32>
    %c14 = arith.constant 14 : index
    %87 = memref.load %arg4[%c14] : memref<18xf32, #tpu.memory_space<smem>>
    %c0_55 = arith.constant 0 : index
    %c2_56 = arith.constant 2 : index
    %c1_57 = arith.constant 1 : index
    %88 = vector.load %arg9[%c0_55, %c2_56, %c1_57] : memref<2x18x18xf32, #tpu.memory_space<vmem>>, vector<1x16x16xf32>
    %89 = vector.shape_cast %88 : vector<1x16x16xf32> to vector<16x16xf32>
    %90 = vector.broadcast %87 : f32 to vector<16x16xf32>
    %91 = arith.mulf %90, %89 : vector<16x16xf32>
    %92 = arith.addf %86, %91 : vector<16x16xf32>
    %c16 = arith.constant 16 : index
    %93 = memref.load %arg4[%c16] : memref<18xf32, #tpu.memory_space<smem>>
    %c0_58 = arith.constant 0 : index
    %c2_59 = arith.constant 2 : index
    %c2_60 = arith.constant 2 : index
    %94 = vector.load %arg9[%c0_58, %c2_59, %c2_60] : memref<2x18x18xf32, #tpu.memory_space<vmem>>, vector<1x16x16xf32>
    %95 = vector.shape_cast %94 : vector<1x16x16xf32> to vector<16x16xf32>
    %96 = vector.broadcast %93 : f32 to vector<16x16xf32>
    %97 = arith.mulf %96, %95 : vector<16x16xf32>
    %98 = arith.addf %92, %97 : vector<16x16xf32>
    %c0_61 = arith.constant 0 : index
    %99 = memref.load %arg5[%c0_61] : memref<2xf32, #tpu.memory_space<smem>>
    %100 = vector.broadcast %99 : f32 to vector<16x16xf32>
    %101 = arith.addf %98, %100 : vector<16x16xf32>
    %cst_62 = arith.constant 0.000000e+00 : f32
    %102 = vector.broadcast %cst_62 : f32 to vector<16x16xf32>
    %c1_63 = arith.constant 1 : index
    %103 = memref.load %arg4[%c1_63] : memref<18xf32, #tpu.memory_space<smem>>
    %c1_64 = arith.constant 1 : index
    %c0_65 = arith.constant 0 : index
    %c0_66 = arith.constant 0 : index
    %104 = vector.load %arg9[%c1_64, %c0_65, %c0_66] : memref<2x18x18xf32, #tpu.memory_space<vmem>>, vector<1x16x16xf32>
    %105 = vector.shape_cast %104 : vector<1x16x16xf32> to vector<16x16xf32>
    %106 = vector.broadcast %103 : f32 to vector<16x16xf32>
    %107 = arith.mulf %106, %105 : vector<16x16xf32>
    %108 = arith.addf %102, %107 : vector<16x16xf32>
    %c3_67 = arith.constant 3 : index
    %109 = memref.load %arg4[%c3_67] : memref<18xf32, #tpu.memory_space<smem>>
    %c1_68 = arith.constant 1 : index
    %c0_69 = arith.constant 0 : index
    %c1_70 = arith.constant 1 : index
    %110 = vector.load %arg9[%c1_68, %c0_69, %c1_70] : memref<2x18x18xf32, #tpu.memory_space<vmem>>, vector<1x16x16xf32>
    %111 = vector.shape_cast %110 : vector<1x16x16xf32> to vector<16x16xf32>
    %112 = vector.broadcast %109 : f32 to vector<16x16xf32>
    %113 = arith.mulf %112, %111 : vector<16x16xf32>
    %114 = arith.addf %108, %113 : vector<16x16xf32>
    %c5 = arith.constant 5 : index
    %115 = memref.load %arg4[%c5] : memref<18xf32, #tpu.memory_space<smem>>
    %c1_71 = arith.constant 1 : index
    %c0_72 = arith.constant 0 : index
    %c2_73 = arith.constant 2 : index
    %116 = vector.load %arg9[%c1_71, %c0_72, %c2_73] : memref<2x18x18xf32, #tpu.memory_space<vmem>>, vector<1x16x16xf32>
    %117 = vector.shape_cast %116 : vector<1x16x16xf32> to vector<16x16xf32>
    %118 = vector.broadcast %115 : f32 to vector<16x16xf32>
    %119 = arith.mulf %118, %117 : vector<16x16xf32>
    %120 = arith.addf %114, %119 : vector<16x16xf32>
    %c7 = arith.constant 7 : index
    %121 = memref.load %arg4[%c7] : memref<18xf32, #tpu.memory_space<smem>>
    %c1_74 = arith.constant 1 : index
    %c1_75 = arith.constant 1 : index
    %c0_76 = arith.constant 0 : index
    %122 = vector.load %arg9[%c1_74, %c1_75, %c0_76] : memref<2x18x18xf32, #tpu.memory_space<vmem>>, vector<1x16x16xf32>
    %123 = vector.shape_cast %122 : vector<1x16x16xf32> to vector<16x16xf32>
    %124 = vector.broadcast %121 : f32 to vector<16x16xf32>
    %125 = arith.mulf %124, %123 : vector<16x16xf32>
    %126 = arith.addf %120, %125 : vector<16x16xf32>
    %c9 = arith.constant 9 : index
    %127 = memref.load %arg4[%c9] : memref<18xf32, #tpu.memory_space<smem>>
    %c1_77 = arith.constant 1 : index
    %c1_78 = arith.constant 1 : index
    %c1_79 = arith.constant 1 : index
    %128 = vector.load %arg9[%c1_77, %c1_78, %c1_79] : memref<2x18x18xf32, #tpu.memory_space<vmem>>, vector<1x16x16xf32>
    %129 = vector.shape_cast %128 : vector<1x16x16xf32> to vector<16x16xf32>
    %130 = vector.broadcast %127 : f32 to vector<16x16xf32>
    %131 = arith.mulf %130, %129 : vector<16x16xf32>
    %132 = arith.addf %126, %131 : vector<16x16xf32>
    %c11 = arith.constant 11 : index
    %133 = memref.load %arg4[%c11] : memref<18xf32, #tpu.memory_space<smem>>
    %c1_80 = arith.constant 1 : index
    %c1_81 = arith.constant 1 : index
    %c2_82 = arith.constant 2 : index
    %134 = vector.load %arg9[%c1_80, %c1_81, %c2_82] : memref<2x18x18xf32, #tpu.memory_space<vmem>>, vector<1x16x16xf32>
    %135 = vector.shape_cast %134 : vector<1x16x16xf32> to vector<16x16xf32>
    %136 = vector.broadcast %133 : f32 to vector<16x16xf32>
    %137 = arith.mulf %136, %135 : vector<16x16xf32>
    %138 = arith.addf %132, %137 : vector<16x16xf32>
    %c13 = arith.constant 13 : index
    %139 = memref.load %arg4[%c13] : memref<18xf32, #tpu.memory_space<smem>>
    %c1_83 = arith.constant 1 : index
    %c2_84 = arith.constant 2 : index
    %c0_85 = arith.constant 0 : index
    %140 = vector.load %arg9[%c1_83, %c2_84, %c0_85] : memref<2x18x18xf32, #tpu.memory_space<vmem>>, vector<1x16x16xf32>
    %141 = vector.shape_cast %140 : vector<1x16x16xf32> to vector<16x16xf32>
    %142 = vector.broadcast %139 : f32 to vector<16x16xf32>
    %143 = arith.mulf %142, %141 : vector<16x16xf32>
    %144 = arith.addf %138, %143 : vector<16x16xf32>
    %c15 = arith.constant 15 : index
    %145 = memref.load %arg4[%c15] : memref<18xf32, #tpu.memory_space<smem>>
    %c1_86 = arith.constant 1 : index
    %c2_87 = arith.constant 2 : index
    %c1_88 = arith.constant 1 : index
    %146 = vector.load %arg9[%c1_86, %c2_87, %c1_88] : memref<2x18x18xf32, #tpu.memory_space<vmem>>, vector<1x16x16xf32>
    %147 = vector.shape_cast %146 : vector<1x16x16xf32> to vector<16x16xf32>
    %148 = vector.broadcast %145 : f32 to vector<16x16xf32>
    %149 = arith.mulf %148, %147 : vector<16x16xf32>
    %150 = arith.addf %144, %149 : vector<16x16xf32>
    %c17 = arith.constant 17 : index
    %151 = memref.load %arg4[%c17] : memref<18xf32, #tpu.memory_space<smem>>
    %c1_89 = arith.constant 1 : index
    %c2_90 = arith.constant 2 : index
    %c2_91 = arith.constant 2 : index
    %152 = vector.load %arg9[%c1_89, %c2_90, %c2_91] : memref<2x18x18xf32, #tpu.memory_space<vmem>>, vector<1x16x16xf32>
    %153 = vector.shape_cast %152 : vector<1x16x16xf32> to vector<16x16xf32>
    %154 = vector.broadcast %151 : f32 to vector<16x16xf32>
    %155 = arith.mulf %154, %153 : vector<16x16xf32>
    %156 = arith.addf %150, %155 : vector<16x16xf32>
    %c1_92 = arith.constant 1 : index
    %157 = memref.load %arg5[%c1_92] : memref<2xf32, #tpu.memory_space<smem>>
    %158 = vector.broadcast %157 : f32 to vector<16x16xf32>
    %159 = arith.addf %156, %158 : vector<16x16xf32>
    %cst_93 = arith.constant 0.000000e+00 : f32
    %160 = vector.broadcast %cst_93 : f32 to vector<16x16xf32>
    %c0_94 = arith.constant 0 : index
    %161 = memref.load %arg6[%c0_94] : memref<4xf32, #tpu.memory_space<smem>>
    %162 = vector.broadcast %161 : f32 to vector<16x16xf32>
    %163 = arith.mulf %162, %101 : vector<16x16xf32>
    %164 = arith.addf %160, %163 : vector<16x16xf32>
    %c1_95 = arith.constant 1 : index
    %165 = memref.load %arg6[%c1_95] : memref<4xf32, #tpu.memory_space<smem>>
    %166 = vector.broadcast %165 : f32 to vector<16x16xf32>
    %167 = arith.mulf %166, %159 : vector<16x16xf32>
    %168 = arith.addf %164, %167 : vector<16x16xf32>
    %c0_96 = arith.constant 0 : index
    %169 = memref.load %arg7[%c0_96] : memref<2xf32, #tpu.memory_space<smem>>
    %170 = vector.broadcast %169 : f32 to vector<16x16xf32>
    %171 = arith.addf %168, %170 : vector<16x16xf32>
    %cst_97 = arith.constant 0.000000e+00 : f32
    %172 = vector.broadcast %cst_97 : f32 to vector<16x16xf32>
    %173 = arith.maximumf %171, %172 : vector<16x16xf32>
    %c0_98 = arith.constant 0 : index
    %c1_99 = arith.constant 1 : index
    %c0_100 = arith.constant 0 : index
    %c0_101 = arith.constant 0 : index
    %174 = vector.load %arg8[%c0_98, %c1_99, %c0_100, %c0_101] : memref<1x4x16x16xf32, #tpu.memory_space<vmem>>, vector<1x1x16x16xf32>
    %175 = vector.shape_cast %174 : vector<1x1x16x16xf32> to vector<16x16xf32>
    %176 = vector.shape_cast %173 : vector<16x16xf32> to vector<1x1x16x16xf32>
    tpu.vector_store %arg8[%c0_98, %c1_99, %c0_100, %c0_101], %176 {strides = array<i32>} : memref<1x4x16x16xf32, #tpu.memory_space<vmem>>, vector<1x1x16x16xf32>,
    %c0_102 = arith.constant 0 : index
    %c0_103 = arith.constant 0 : index
    %c0_104 = arith.constant 0 : index
    %c0_105 = arith.constant 0 : index
    %177 = vector.load %arg1[%c0_102, %c0_103, %c0_104, %c0_105] : memref<1x4x16x16xf32, #tpu.memory_space<vmem>>, vector<1x1x16x16xf32>
    %178 = vector.shape_cast %177 : vector<1x1x16x16xf32> to vector<16x16xf32>
    %c0_106 = arith.constant 0 : index
    %c0_107 = arith.constant 0 : index
    %c0_108 = arith.constant 0 : index
    %c0_109 = arith.constant 0 : index
    %179 = vector.load %arg8[%c0_106, %c0_107, %c0_108, %c0_109] : memref<1x4x16x16xf32, #tpu.memory_space<vmem>>, vector<1x1x16x16xf32>
    %180 = vector.shape_cast %179 : vector<1x1x16x16xf32> to vector<16x16xf32>
    %181 = vector.shape_cast %178 : vector<16x16xf32> to vector<1x1x16x16xf32>
    tpu.vector_store %arg8[%c0_106, %c0_107, %c0_108, %c0_109], %181 {strides = array<i32>} : memref<1x4x16x16xf32, #tpu.memory_space<vmem>>, vector<1x1x16x16xf32>,
    %cst_110 = arith.constant 0.000000e+00 : f32
    %182 = vector.broadcast %cst_110 : f32 to vector<16x16xf32>
    %c2_111 = arith.constant 2 : index
    %183 = memref.load %arg6[%c2_111] : memref<4xf32, #tpu.memory_space<smem>>
    %184 = vector.broadcast %183 : f32 to vector<16x16xf32>
    %185 = arith.mulf %184, %101 : vector<16x16xf32>
    %186 = arith.addf %182, %185 : vector<16x16xf32>
    %c3_112 = arith.constant 3 : index
    %187 = memref.load %arg6[%c3_112] : memref<4xf32, #tpu.memory_space<smem>>
    %188 = vector.broadcast %187 : f32 to vector<16x16xf32>
    %189 = arith.mulf %188, %159 : vector<16x16xf32>
    %190 = arith.addf %186, %189 : vector<16x16xf32>
    %c1_113 = arith.constant 1 : index
    %191 = memref.load %arg7[%c1_113] : memref<2xf32, #tpu.memory_space<smem>>
    %192 = vector.broadcast %191 : f32 to vector<16x16xf32>
    %193 = arith.addf %190, %192 : vector<16x16xf32>
    %cst_114 = arith.constant 0.000000e+00 : f32
    %194 = vector.broadcast %cst_114 : f32 to vector<16x16xf32>
    %195 = arith.maximumf %193, %194 : vector<16x16xf32>
    %c0_115 = arith.constant 0 : index
    %c3_116 = arith.constant 3 : index
    %c0_117 = arith.constant 0 : index
    %c0_118 = arith.constant 0 : index
    %196 = vector.load %arg8[%c0_115, %c3_116, %c0_117, %c0_118] : memref<1x4x16x16xf32, #tpu.memory_space<vmem>>, vector<1x1x16x16xf32>
    %197 = vector.shape_cast %196 : vector<1x1x16x16xf32> to vector<16x16xf32>
    %198 = vector.shape_cast %195 : vector<16x16xf32> to vector<1x1x16x16xf32>
    tpu.vector_store %arg8[%c0_115, %c3_116, %c0_117, %c0_118], %198 {strides = array<i32>} : memref<1x4x16x16xf32, #tpu.memory_space<vmem>>, vector<1x1x16x16xf32>,
    %c0_119 = arith.constant 0 : index
    %c1_120 = arith.constant 1 : index
    %c0_121 = arith.constant 0 : index
    %c0_122 = arith.constant 0 : index
    %199 = vector.load %arg1[%c0_119, %c1_120, %c0_121, %c0_122] : memref<1x4x16x16xf32, #tpu.memory_space<vmem>>, vector<1x1x16x16xf32>
    %200 = vector.shape_cast %199 : vector<1x1x16x16xf32> to vector<16x16xf32>
    %c0_123 = arith.constant 0 : index
    %c2_124 = arith.constant 2 : index
    %c0_125 = arith.constant 0 : index
    %c0_126 = arith.constant 0 : index
    %201 = vector.load %arg8[%c0_123, %c2_124, %c0_125, %c0_126] : memref<1x4x16x16xf32, #tpu.memory_space<vmem>>, vector<1x1x16x16xf32>
    %202 = vector.shape_cast %201 : vector<1x1x16x16xf32> to vector<16x16xf32>
    %203 = vector.shape_cast %200 : vector<16x16xf32> to vector<1x1x16x16xf32>
    tpu.vector_store %arg8[%c0_123, %c2_124, %c0_125, %c0_126], %203 {strides = array<i32>} : memref<1x4x16x16xf32, #tpu.memory_space<vmem>>, vector<1x1x16x16xf32>,
    return
  }
  func.func @transform_0(%arg0: i32) -> (i32, i32, i32, i32) {
    %c0_i32 = arith.constant 0 : i32
    %c0_i32_0 = arith.constant 0 : i32
    %c0_i32_1 = arith.constant 0 : i32
    %c0_i32_2 = arith.constant 0 : i32
    return %arg0, %c0_i32, %c0_i32_0, %c0_i32_1 : i32, i32, i32, i32
  }
  func.func @transform_1(%arg0: i32) -> i32 {
    %c0_i32 = arith.constant 0 : i32
    %c0_i32_0 = arith.constant 0 : i32
    return %c0_i32 : i32
  }
  func.func @transform_2(%arg0: i32) -> i32 {
    %c0_i32 = arith.constant 0 : i32
    %c0_i32_0 = arith.constant 0 : i32
    return %c0_i32 : i32
  }
  func.func @transform_3(%arg0: i32) -> i32 {
    %c0_i32 = arith.constant 0 : i32
    %c0_i32_0 = arith.constant 0 : i32
    return %c0_i32 : i32
  }
  func.func @transform_4(%arg0: i32) -> i32 {
    %c0_i32 = arith.constant 0 : i32
    %c0_i32_0 = arith.constant 0 : i32
    return %c0_i32 : i32
  }
  func.func @transform_5(%arg0: i32) -> i32 {
    %c0_i32 = arith.constant 0 : i32
    %c0_i32_0 = arith.constant 0 : i32
    return %c0_i32 : i32
  }
  func.func @transform_6(%arg0: i32) -> i32 {
    %c0_i32 = arith.constant 0 : i32
    %c0_i32_0 = arith.constant 0 : i32
    return %c0_i32 : i32
  }
  func.func @transform_7(%arg0: i32) -> (i32, i32, i32, i32) {
    %c0_i32 = arith.constant 0 : i32
    %c0_i32_0 = arith.constant 0 : i32
    %c0_i32_1 = arith.constant 0 : i32
    %c0_i32_2 = arith.constant 0 : i32
    return %arg0, %c0_i32, %c0_i32_0, %c0_i32_1 : i32, i32, i32, i32
  }
}

</mosaic_0001>

<bundles_post_ra>
// kernel: tpu_custom_call.1
= control target key start
LH: loop header
LB: loop body
LE: loop exit
PB: predicated region body
PF: predicated region fallthrough
CT: control target
= control target key end

     0   :  { %12 = vsyncpa [#allocation4], 0  ;;  %s1725_s0 = inlined_call_operand.hbm [shape: f32[2,4,16,16], index: 0, kind: input, shape index: {}]   ;;  %s1726_s1 = inlined_call_operand.vmem [shape: f32[4], index: 1, kind: input, shape index: {}]   ;;  %s1727_s2 = inlined_call_operand.vmem [shape: f32[2], index: 2, kind: input, shape index: {}]   ;;  %s1728_s3 = inlined_call_operand.vmem [shape: f32[18], index: 3, kind: input, shape index: {}]   ;;  %s1729_s4 = inlined_call_operand.vmem [shape: f32[2], index: 4, kind: input, shape index: {}]   ;;  %s1730_s5 = inlined_call_operand.vmem [shape: f32[4], index: 5, kind: input, shape index: {}]   ;;  %s1731_s6 = inlined_call_operand.vmem [shape: f32[2], index: 6, kind: input, shape index: {}]   ;;  %s1732_s7 = inlined_call_operand.hbm [shape: f32[2,4,16,16], index: 7, kind: output, shape index: {}]  }
   0x1   :  { %14 = vsyncpa [#allocation4 + $0x1], 0 }
   0x2   :  { %15 = vsyncpa [#allocation6], 0 }
   0x3   :  { %16 = vsyncpa [#allocation9], 0 }
   0x4   :  { %17 = vsyncpa [#allocation12], 0 }
   0x5   :  { %18 = vsyncpa [#allocation15], 0 }
   0x6   :  { %19 = vsyncpa [#allocation5], 0 }
   0x7   :  { %21 = vsyncpa [#allocation5 + $0x1], 0  ;;  %s1319_s24 = smov 0   ;;  %s1321_s25 = smov 0  }
   0x8   :  { %s1323_s26 = smov 0   ;;  %s1325_s27 = smov 0  }
   0x9 LB: > { %s234_s30 = sshll.u32 %s1727_s2, 4  ;;  %s1343_s8 = sadd.s32 4294967295, %s1261_s27   ;;  %s1261_s27 = sphi %s1325_s27, %s1760_s27   ;;  %s1257_s26 = sphi %s1323_s26, %s1759_s26   ;;  %s1253_s25 = sphi %s1321_s25, %s1758_s25   ;;  %s1249_s24 = sphi %s1319_s24, %s1757_s24   ;;  %s235_s30 = int_to_ptr.vmem [resolvable:$true] %s234_s30 }
   0xa   : > { %p875_p0 = scmp.ge.s32.totalorder %s1261_s27, 1  ;;  %p1733_p1 = scmp.eq.s32.totalorder %s1343_s8, 0 }
   0xb   : > { %p210_p2 = scmp.lt.s32.totalorder %s1261_s27, 3  ;;  %s256_s12 = sshll.u32 %s1729_s4, 4  ;;  %s257_s12 = int_to_ptr.vmem [resolvable:$true] %s256_s12 }
   0xc   : > { %s223_s15 = sshll.u32 %s1726_s1, 4  ;;  %s245_s19 = sshll.u32 %s1728_s3, 4  ;;  %s1367_s15 = int_to_ptr.vmem [resolvable:$true] %s223_s15  ;;  %s1372_s19 = int_to_ptr.vmem [resolvable:$true] %s245_s19 }
   0xd   : > { %p1348_p3 = pnand %p875_p0, %p210_p2  ;;  %s1059_s20 = scalar_lea.vmem %s235_s30, 16 }
   0xe   : > { %p1060_p7 = scmp.ne.s32.totalorder %s235_s30, %s1059_s20  ;;  %p1067_p11 = scmp.lt.s32.totalorder %s235_s30, %s235_s30 }
   0xf   : > { %s1736_s9 = scalar_select %p1348_p3, 1, 0 }
  0x10   : > { %p972_p5 = pneg %p1348_p3  ;;  %p1068_p12 = scmp.lt.s32.totalorder %s1059_s20, %s1059_s20 }
  0x12   : > { %p1363_p6 = pnand %p972_p5, %p1733_p1  ;;  %p1069_p13 = por %p1068_p12, %p1067_p11 }
  0x14   : > { %p1376_p8 = pneg %p1363_p6 }
  0x16   : > { %p1062_p9 = pnand %p1376_p8, %p1060_p7 }
  0x18   : > { %p1063_p10 = pneg %p1062_p9 }
  0x1a   : > { %p1070_p0 = pnand %p1069_p13, %p1063_p10 }
  0x1c   : > { %1073 = shalt.err (!%p1070_p0)
}
  0x1d   : > { %s1263_s22 = smov [#allocation8]   ;;  %s1074_s23 = scalar_lea.vmem %s257_s12, 16 }
  0x1e   : > { %978 = dma.vmem_to_smem (!%p1363_p6), %s235_s30, 16, %s1263_s22, [#allocation9]  }
  0x1f   : > { %p1075_p2 = scmp.ne.s32.totalorder %s257_s12, %s1074_s23  ;;  %p1082_p1 = scmp.lt.s32.totalorder %s257_s12, %s257_s12 }
  0x20   : > { %p1083_p3 = scmp.lt.s32.totalorder %s1074_s23, %s1074_s23 }
  0x21   : > { %p1077_p5 = pnand %p1075_p2, %p1376_p8 }
  0x22   : > { %p1084_p7 = por %p1083_p3, %p1082_p1 }
  0x23   : > { %p1078_p4 = pneg %p1077_p5 }
  0x25   : > { %p1085_p9 = pnand %p1084_p7, %p1078_p4 }
  0x27   : > { %1088 = shalt.err (!%p1085_p9)
}
  0x28   : > { %s1264_s28 = smov [#allocation11]   ;;  %s1089_s29 = scalar_lea.vmem %s1367_s15, 16 }
  0x29   : > { %984 = dma.vmem_to_smem (!%p1363_p6), %s257_s12, 16, %s1264_s28, [#allocation12]  }
  0x2a   : > { %p1090_p10 = scmp.ne.s32.totalorder %s1367_s15, %s1089_s29  ;;  %p1097_p13 = scmp.lt.s32.totalorder %s1367_s15, %s1367_s15 }
  0x2b   : > { %p1098_p0 = scmp.lt.s32.totalorder %s1089_s29, %s1089_s29 }
  0x2c   : > { %p1092_p11 = pnand %p1090_p10, %p1376_p8 }
  0x2d   : > { %p1099_p2 = por %p1098_p0, %p1097_p13 }
  0x2e   : > { %p1093_p12 = pneg %p1092_p11 }
  0x30   : > { %p1100_p1 = pnand %p1099_p2, %p1093_p12 }
  0x32   : > { %1103 = shalt.err (!%p1100_p1)
}
  0x33   : > { %s1265_s30 = smov [#allocation7]   ;;  %s1104_s10 = scalar_lea.vmem %s1372_s19, 16 }
  0x34   : > { %975 = dma.vmem_to_smem (!%p1363_p6), %s1367_s15, 16, %s1265_s30, [#allocation6]  }
  0x35   : > { %p1105_p3 = scmp.ne.s32.totalorder %s1372_s19, %s1104_s10  ;;  %p1112_p7 = scmp.lt.s32.totalorder %s1372_s19, %s1372_s19 }
  0x36   : > { %p1113_p9 = scmp.lt.s32.totalorder %s1104_s10, %s1104_s10 }
  0x37   : > { %p1107_p4 = pnand %p1105_p3, %p1376_p8 }
  0x38   : > { %p1114_p10 = por %p1113_p9, %p1112_p7 }
  0x39   : > { %p1108_p5 = pneg %p1107_p4 }
  0x3b   : > { %p1115_p11 = pnand %p1114_p10, %p1108_p5 }
  0x3d   : > { %1118 = shalt.err (!%p1115_p11)
}
  0x3e   : > { %s1266_s11 = smov [#allocation10]   ;;  %s267_s14 = sshll.u32 %s1730_s5, 4  ;;  %s268_s14 = int_to_ptr.vmem [resolvable:$true] %s267_s14 }
  0x3f   : > { %981 = dma.vmem_to_smem (!%p1363_p6), %s1372_s19, 16, %s1266_s11, [#allocation9]  }
  0x40   : > { %s278_s18 = sshll.u32 %s1731_s6, 4  ;;  %s1119_s20 = scalar_lea.vmem %s268_s14, 16  ;;  %s279_s18 = int_to_ptr.vmem [resolvable:$true] %s278_s18 }
  0x41   : > { %p1120_p12 = scmp.ne.s32.totalorder %s268_s14, %s1119_s20  ;;  %p1127_p2 = scmp.lt.s32.totalorder %s268_s14, %s268_s14 }
  0x42   : > { %p1128_p1 = scmp.lt.s32.totalorder %s1119_s20, %s1119_s20 }
  0x43   : > { %p1122_p13 = pnand %p1120_p12, %p1376_p8 }
  0x44   : > { %p1129_p3 = por %p1128_p1, %p1127_p2 }
  0x45   : > { %p1123_p0 = pneg %p1122_p13 }
  0x47   : > { %p1130_p4 = pnand %p1129_p3, %p1123_p0 }
  0x49   : > { %1133 = shalt.err (!%p1130_p4)
}
  0x4a   : > { %s1267_s19 = smov [#allocation13]   ;;  %s1134_s22 = scalar_lea.vmem %s279_s18, 16 }
  0x4b   : > { %987 = dma.vmem_to_smem (!%p1363_p6), %s268_s14, 16, %s1267_s19, [#allocation12]  }
  0x4c   : > { %p1135_p5 = scmp.ne.s32.totalorder %s279_s18, %s1134_s22  ;;  %p1142_p10 = scmp.lt.s32.totalorder %s279_s18, %s279_s18 }
  0x4d   : > { %p1143_p11 = scmp.lt.s32.totalorder %s1134_s22, %s1134_s22 }
  0x4e   : > { %p1137_p7 = pnand %p1135_p5, %p1376_p8 }
  0x4f   : > { %p1144_p12 = por %p1143_p11, %p1142_p10 }
  0x50   : > { %p1138_p9 = pneg %p1137_p7 }
  0x52   : > { %p1145_p13 = pnand %p1144_p12, %p1138_p9 }
  0x54   : > { %1148 = shalt.err (!%p1145_p13)
}
  0x55   : > { %s1268_s23 = smov [#allocation14]   ;;  %s874_s21 = sadd.s32 4294967294, %s1261_s27  }
  0x56   : > { %990 = dma.vmem_to_smem (!%p1363_p6), %s279_s18, 16, %s1268_s23, [#allocation15]  }
  0x57   : > { %s1422_s28 = sadd.s32 1, %s1261_s27   ;;  %s34_s29 = sadd.s32 1, %s1257_s26 }
  0x58   : > { %s31_s16 = ssub.s32 %s1261_s27, %s1422_s28  ;;  %p41_p0 = scmp.ne.s32.totalorder %s1257_s26, %s1253_s25 }
  0x59   : > { %p32_p8 = scmp.eq.s32.totalorder %s31_s16, 0  ;;  %p42_p2 = scmp.eq.s32.totalorder %s1261_s27, 0 }
  0x5a   : > { %p47_p1 = scmp.ne.s32.totalorder %s1253_s25, %s1249_s24  ;;  %p1740_p4 = scmp.eq.s32.totalorder %s1343_s8, 0 }
  0x5b   : > { %s1433_s30 = scalar_select %p32_p8, %s1257_s26, %s34_s29  }
  0x5c   : > { %p1435_p3 = por %p42_p2, %p41_p0  ;;  %p1441_p6 = por %p1740_p4, %p47_p1 }
  0x5d   : > { %p197_p5 = scmp.eq.s32.totalorder %s1343_s8, 1  ;;  %p203_p7 = scmp.eq.s32.totalorder %s874_s21, 1 }
  0x5e   : > { %p1005_p9 = scmp.lt.s32.totalorder %s1261_s27, 2  ;;  %s289_s12 = sand.u32 1, %s1257_s26  }
  0x5f   : > { %p1448_p10 = por %p197_p5, %p41_p0  ;;  %p1452_p11 = por %p203_p7, %p47_p1 }
  0x60   : > { %s883_s15 = sshll.u32 %s289_s12, 6  ;;  %s942_s17 = sshll.u32 %s1261_s27, 10 }
  0x61   : > { %s1742_s13 = scalar_select %p1448_p10, 1, 0 }
  0x62   : > { %s1743_s14 = scalar_select %p1452_p11, 1, 0 }
  0x63   : > { %s1460_s19 = scalar_lea.hbm %s1725_s0, %s942_s17  ;;  %s293_s22 = scalar_lea.vmem [#allocation3], %s883_s15 }
  0x64   : > { %s300_s23 = sshll.u32 %s293_s22, 4  ;;  %p1466_p12 = pnand %p1005_p9, %p1435_p3  ;;  %s1462_s23 = int_to_ptr.vmem [resolvable:$true] %s300_s23 }
  0x65   : > { %s1470_s16 = scalar_lea.sflag [#allocation4], %s289_s12  ;;  %s1149_s29 = scalar_lea.hbm %s1460_s19, 1024 }
  0x66   : > { %p1150_p13 = scmp.ne.s32.totalorder %s1460_s19, %s1149_s29  ;;  %p1151_p8 = pneg %p1466_p12 }
  0x67   : > { %s1154_s10 = scalar_lea.hbm %s1725_s0, 2048  ;;  %p1155_p1 = scmp.lt.u32.totalorder %s1460_s19, %s1725_s0 }
  0x68   : > { %p1152_p0 = pnand %p1151_p8, %p1150_p13  ;;  %p1156_p3 = scmp.lt.u32.totalorder %s1154_s10, %s1149_s29 }
  0x69   : > { %p1158_p5 = scmp.lt.u32.totalorder %s1149_s29, %s1460_s19 }
  0x6a   : > { %p1153_p2 = pneg %p1152_p0  ;;  %p1157_p4 = por %p1156_p3, %p1155_p1 }
  0x6c   : > { %p1159_p7 = por %p1158_p5, %p1157_p4 }
  0x6e   : > { %p1160_p9 = pnand %p1159_p7, %p1153_p2 }
  0x70   : > { %1163 = shalt.err (!%p1160_p9)
}
  0x71   : > { %s1164_s12 = scalar_lea.vmem %s1462_s23, 1024  ;;  %s1269_s22 = smov [#allocation3]  }
  0x72   : > { %p1165_p13 = scmp.ne.s32.totalorder %s1462_s23, %s1164_s12  ;;  %s1169_s15 = sshll.u32 %s1269_s22, 4  ;;  %s1170_s15 = int_to_ptr.vmem [resolvable:$false] %s1169_s15 }
  0x73   : > { %s1171_s17 = scalar_lea.vmem %s1170_s15, 2048  ;;  %p1172_p10 = scmp.lt.s32.totalorder %s1462_s23, %s1170_s15 }
  0x74   : > { %p1167_p0 = pnand %p1165_p13, %p1151_p8  ;;  %p1173_p1 = scmp.lt.s32.totalorder %s1171_s17, %s1164_s12 }
  0x76   : > { %p1168_p11 = pneg %p1167_p0  ;;  %p1174_p3 = por %p1173_p1, %p1172_p10 }
  0x78   : > { %p1175_p4 = pnand %p1174_p3, %p1168_p11 }
  0x7a   : > { %1178 = shalt.err (!%p1175_p4)
}
  0x7b   : > { %s1270_s29 = smov 128   ;;  %s1271_s10 = smov 8  }
  0x7c   : > { %994 = dma.hbm_to_vmem [thread:$0]  (!%p1466_p12), %s1460_s19, 1024, %s1462_s23, %s1470_s16, %s1270_s29, %s1270_s29, %s1271_s10  }
  0x7d   : > { %p1745_p8 = scmp.ne.s32.totalorder %s1736_s9, 0 }
  0x7e   : > { %s1501_s18 = sand.u32 (!%p1745_p8), 1, %s1253_s25  }
  0x7f   : > { %312 = sbr.rel (%p1745_p8) target bundleno = 482 (0x1e2), region = 48  ;;  %s887_s20 = sshll.u32 (!%p1745_p8), %s1501_s18, 6 }
  0x80   : > { %s315_s12 = scalar_lea.sflag (!%p1745_p8), [#allocation4], %s1501_s18  ;;  %s1507_s22 = scalar_lea.vmem (!%p1745_p8), [#allocation3], %s887_s20 }
  0x86   : > { %1224 = dma.done.wait (%p1441_p6), %s315_s12, 1024  }
  0x87   : > { %1226 = vsyncadd (%p1441_p6), %s315_s12, 4294966272  ;;  %p1746_p10 = scmp.eq.s32.totalorder %s1343_s8, 0 }
  0x89   : > { %1228 = dma.done.wait (%p1746_p10), [#allocation6], 16   ;;  %p1747_p11 = pmov %p1746_p10 }
  0x8a   : > { %p1748_p12 = pmov %p1746_p10 }
  0x8b   : > { %1230 = vsyncadd (%p1747_p11), [#allocation6], 4294967280 }
  0x8c   : > { %1232 = dma.done.wait (%p1748_p12), [#allocation9], 32   ;;  %p1749_p2 = pmov %p1746_p10 }
  0x8e   : > { %1234 = vsyncadd (%p1749_p2), [#allocation9], 4294967264  ;;  %p1750_p5 = pmov %p1749_p2 }
  0x8f   : > { %p1751_p7 = pmov %p1749_p2 }
  0x90   : > { %1236 = dma.done.wait (%p1750_p5), [#allocation12], 32  }
  0x91   : > { %1238 = vsyncadd (%p1751_p7), [#allocation12], 4294967264  ;;  %p1752_p6 = pmov %p1749_p2 }
  0x92   : > { %p1753_p9 = pmov %p1749_p2 }
  0x93   : > { %1240 = dma.done.wait (%p1752_p6), [#allocation15], 16  }
  0x94   : > { %1242 = vsyncadd (%p1753_p9), [#allocation15], 4294967280 }
  0x95   : > { %347 = sfence }
  0x96   : > { %s900_s9 = sld [smem:[#allocation7 + $0x2]]  ;;  %s903_s11 = sld [smem:[#allocation7 + $0x3]]  ;;  %vm374_vm0 = vcmask 146432   ;;  %v1272_v0 = vmov 0.0   ;;  %v901_v1 = vld [vmem:[%s1507_s22 + $0x20] sm:$0xff]  ;;  %v902_v2 = vld [vmem:[%s1507_s22 + $0x28] sm:$0xff] }
  0x97   : > { %s1529_s19 = sld [smem:[#allocation8 + $0x1]]  ;;  %s382_s23 = sld [smem:[#allocation7]]  ;;  %379 = vst.msk [vmem:[#allocation2 + $0x18] sm:$0xff] %vm374_vm0, %v1272_v0  ;;  %380 = vst.msk [vmem:[#allocation2 + $0x20] sm:$0xff] %vm374_vm0, %v1272_v0  ;;  %v904_v3 = vld [vmem:[%s1507_s22 + $0x30] sm:$0xff]  ;;  %v905_v4 = vld [vmem:[%s1507_s22 + $0x38] sm:$0xff] }
  0x98   : > { %s897_s21 = sld [smem:[#allocation7 + $0x1]]  ;;  %s1531_s16 = sld [smem:[#allocation8]]  ;;  %375 = vst.msk [vmem:[#allocation2] sm:$0xff] %vm374_vm0, %v1272_v0  ;;  %376 = vst.msk [vmem:[#allocation2 + $0x8] sm:$0xff] %vm374_vm0, %v1272_v0  ;;  %vm377_vm1 = vcmask 140288   ;;  %vm414_vm2 = vcmask 138248  }
  0x99   : > { %381 = vst.msk [vmem:[#allocation2 + $0x28] sm:$0x3] %vm377_vm1, %v1272_v0  ;;  %378 = vst.msk [vmem:[#allocation2 + $0x10] sm:$0x3] %vm377_vm1, %v1272_v0  ;;  %s1273_s15 = smov 1   ;;  %s907_s17 = sld [smem:[#allocation10 + $0x2]] }
  0x9a   : > { %s916_s29 = sld [smem:[#allocation10 + $0x3]]  ;;  %s908_s10 = sld [smem:[#allocation10 + $0x4]]  ;;  %vm693_vm3 = vcmask 130048  }
  0x9b   : > { %s917_s12 = sld [smem:[#allocation10 + $0x5]]  ;;  %p1754_p0 = scmp.ne.s32.totalorder %s1742_s13, 0 }
  0x9c   : > { %v420_v5 = vstv %s900_s9  ;;  %v428_v8 = vstv %s903_s11  ;;  %s1274_s9 = smov 127   ;;  %s910_s11 = sld [smem:[#allocation10 + $0x8]] }
  0x9d   : > { %v421_v6 = vmul.f32 %v901_v1, %v420_v5  ;;  %v422_v7 = vmul.f32 %v902_v2, %v420_v5  ;;  %v434_v9 = vstv %s1529_s19  ;;  %v429_v10 = vmul.f32 %v904_v3, %v428_v8  ;;  %s919_s19 = sld [smem:[#allocation10 + $0x9]] }
  0x9e   : > { %v430_v11 = vmul.f32 %v905_v4, %v428_v8  ;;  %v386_v12 = vstv %s382_s23  ;;  %v395_v13 = vstv %s897_s21  ;;  %v401_v20 = vstv %s1531_s16  ;;  %s1275_s23 = smov 126   ;;  %s911_s21 = sld [smem:[#allocation10 + $0xa]] }
  0x9f   : > { %v387_v14 = vmul.f32 %v901_v1, %v386_v12  ;;  %v388_v15 = vmul.f32 %v902_v2, %v386_v12  ;;  %v396_v16 = vmul.f32 %v904_v3, %v395_v13  ;;  %v397_v17 = vmul.f32 %v905_v4, %v395_v13  ;;  %s920_s16 = sld [smem:[#allocation10 + $0xb]] }
  0xa0   : > { %v431_v18 = vadd.f32 %v429_v10, %v421_v6  ;;  %v432_v19 = vadd.f32 %v430_v11, %v422_v7  ;;  %v459_v35 = vstv %s907_s17  ;;  %v571_v38 = vstv %s916_s29  ;;  %s922_s17 = sld [smem:[#allocation10 + $0xf]]  ;;  %s914_s29 = sld [smem:[#allocation10 + $0x10]] }
  0xa1   : > { %v398_v21 = vadd.f32 %v396_v16, %v387_v14  ;;  %v399_v22 = vadd.f32 %v397_v17, %v388_v15  ;;  %v473_v44 = vstv %s908_s10  ;;  %v585_v47 = vstv %s917_s12  ;;  %s923_s10 = sld [smem:[#allocation10 + $0x11]]  ;;  %s1616_s12 = scalar_lea.vmem [#allocation16], %s887_s20 }
  0xa2   : > { %v435_v23 = vadd.f32 %v434_v9, %v431_v18  ;;  %v436_v24 = vadd.f32 %v434_v9, %v432_v19  ;;  %v495_v51 = vstv %s910_s11  ;;  %v696_v19 = vld [vmem:[%s1507_s22] sm:$0xff]  ;;  %s915_s11 = sld [smem:[#allocation10 + $0x1]]  ;;  %s912_s20 = sld [smem:[#allocation10 + $0xc]] }
  0xa3   : > { %v402_v25 = vadd.f32 %v401_v20, %v398_v21  ;;  %v403_v26 = vadd.f32 %v401_v20, %v399_v22  ;;  %v607_v56 = vstv %s919_s19  ;;  %v697_v20 = vld [vmem:[%s1507_s22 + $0x8] sm:$0xff]  ;;  %v933_v21 = vld [vmem:[%s1507_s22 + $0x10] sm:$0xff]  ;;  %698 = vst.msk [vmem:[%s1616_s12] sm:$0xff] %vm693_vm3, %v696_v19  ;;  %s909_s19 = sld [smem:[#allocation10 + $0x6]] }
  0xa4   : > { %v437_v27 = vmax.f32 %v435_v23, 0.0  ;;  %v438_v29 = vmax.f32 %v436_v24, 0.0  ;;  %v509_v60 = vstv %s911_s21  ;;  %699 = vst.msk [vmem:[%s1616_s12 + $0x8] sm:$0xff] %vm693_vm3, %v697_v20  ;;  %v934_v22 = vld [vmem:[%s1507_s22 + $0x18] sm:$0xff]  ;;  %935 = vst.msk [vmem:[%s1616_s12 + $0x20] sm:$0xff] %vm693_vm3, %v933_v21  ;;  %s921_s22 = sld [smem:[#allocation10 + $0xd]] }
  0xa5   : > { %v404_v28 = vmax.f32 %v402_v25, 0.0  ;;  %v405_v30 = vmax.f32 %v403_v26, 0.0  ;;  %v621_v63 = vstv %s920_s16  ;;  %936 = vst.msk [vmem:[%s1616_s12 + $0x28] sm:$0xff] %vm693_vm3, %v934_v22  ;;  %s1642_s21 = sld [smem:[#allocation11]]  ;;  %s1644_s16 = sld [smem:[#allocation11 + $0x1]] }
  0xa6   : > { %441 = vrot.lane.b32.xlu1 %v437_v27, %s1273_s15  ;;  %v643_v8 = vstv %s922_s17  ;;  %v545_v12 = vstv %s914_s29  ;;  %s1648_s17 = sld [smem:[#allocation13 + $0x2]]  ;;  %s1650_s29 = sld [smem:[#allocation13 + $0x1]] }
  0xa7   : > { %408 = vrot.lane.b32.xlu0 %v404_v28, %s1273_s15  ;;  %v657_v15 = vstv %s923_s10  ;;  %s1652_s10 = sld [smem:[#allocation13 + $0x3]] }
  0xa8   : > { %v565_v28 = vstv %s915_s11  ;;  %s1657_s11 = sld [smem:[#allocation14 + $0x1]] }
  0xaa   : > { %443 = vrot.lane.b32.xlu1 %v438_v29, %s1273_s15  ;;  %v489_v29 = vstv %s909_s19  ;;  %s943_s19 = sshll.u32 %s1343_s8, 10  ;;  %s728_s8 = scalar_lea.sflag [#allocation5], %s1501_s18 }
  0xab   : > { %410 = vrot.lane.b32.xlu0 %v405_v30, %s1273_s15  ;;  %s913_s15 = sld [smem:[#allocation10 + $0xe]] }
  0xb1   : > { %v531_v3 = vstv %s913_s15  ;;  %s1646_s15 = sld [smem:[#allocation13]] }
 0x118   : > { %v442_v31 = vpop.permute.xlu1 %441 }
 0x119   : > { %448 = vst.msk [vmem:[#allocation2 + $0x19] sm:$0xff] %vm414_vm2, %v442_v31  ;;  %v409_v32 = vpop.permute.xlu0 %408 }
 0x11a   : > { %415 = vst.msk [vmem:[#allocation2 + $0x1] sm:$0xff] %vm414_vm2, %v409_v32 }
 0x11c   : > { %v444_v33 = vpop.permute.xlu1 %443 }
 0x11d   : > { %449 = vst.msk [vmem:[#allocation2 + $0x21] sm:$0xff] %vm414_vm2, %v444_v33  ;;  %v411_v34 = vpop.permute.xlu0 %410 }
 0x11e   : > { %416 = vst.msk [vmem:[#allocation2 + $0x9] sm:$0xff] %vm414_vm2, %v411_v34 }
 0x120   : > { %v1541_v37 = vld [vmem:[#allocation2 + $0x18] sm:$0xff] }
 0x121   : > { %v1539_v36 = vld [vmem:[#allocation2] sm:$0xff]  ;;  %v572_v40 = vmul.f32 %v571_v38, %v1541_v37  ;;  %v586_v49 = vmul.f32 %v585_v47, %v1541_v37 }
 0x122   : > { %v460_v39 = vmul.f32 %v459_v35, %v1539_v36  ;;  %v474_v46 = vmul.f32 %v473_v44, %v1539_v36  ;;  %v1559_v50 = vld [vmem:[#allocation2 + $0x1] sm:$0xff]  ;;  %v1567_v55 = vld [vmem:[#allocation2 + $0x19] sm:$0xff] }
 0x123   : > { %v496_v53 = vmul.f32 %v495_v51, %v1559_v50  ;;  %v608_v58 = vmul.f32 %v607_v56, %v1567_v55  ;;  %v510_v62 = vmul.f32 %v509_v60, %v1559_v50  ;;  %v622_v1 = vmul.f32 %v621_v63, %v1567_v55 }
 0x124   : > { %464 = vrot.lane.b32.xlu0 %v460_v39, %s1274_s9  ;;  %v1549_v43 = vld [vmem:[#allocation2 + $0x20] sm:$0xff]  ;;  %v490_v39 = vmul.f32 %v489_v29, %v1559_v50 }
 0x125   : > { %v1546_v41 = vld [vmem:[#allocation2 + $0x8] sm:$0xff]  ;;  %v573_v45 = vmul.f32 %v571_v38, %v1549_v43  ;;  %v587_v52 = vmul.f32 %v585_v47, %v1549_v43  ;;  %v1591_v7 = vld [vmem:[#allocation2 + $0x1a] sm:$0xff]  ;;  %v567_v47 = vmul.f32 %v565_v28, %v1549_v43 }
 0x126   : > { %v461_v42 = vmul.f32 %v459_v35, %v1546_v41  ;;  %v475_v48 = vmul.f32 %v473_v44, %v1546_v41  ;;  %v1565_v54 = vld [vmem:[#allocation2 + $0x9] sm:$0xff]  ;;  %v1573_v59 = vld [vmem:[#allocation2 + $0x21] sm:$0xff]  ;;  %v644_v10 = vmul.f32 %v643_v8, %v1591_v7  ;;  %v658_v17 = vmul.f32 %v657_v15, %v1591_v7 }
 0x127   : > { %v497_v57 = vmul.f32 %v495_v51, %v1565_v54  ;;  %v609_v61 = vmul.f32 %v607_v56, %v1573_v59  ;;  %v511_v0 = vmul.f32 %v509_v60, %v1565_v54  ;;  %v1583_v2 = vld [vmem:[#allocation2 + $0x2] sm:$0xff]  ;;  %v623_v4 = vmul.f32 %v621_v63, %v1573_v59  ;;  %v1589_v6 = vld [vmem:[#allocation2 + $0xa] sm:$0xff] }
 0x128   : > { %466 = vrot.lane.b32.xlu1 %v461_v42, %s1274_s9  ;;  %576 = vrot.lane.b32.xlu0 %v572_v40, %s1274_s9  ;;  %v532_v5 = vmul.f32 %v531_v3, %v1583_v2  ;;  %v533_v9 = vmul.f32 %v531_v3, %v1589_v6  ;;  %v1597_v11 = vld [vmem:[#allocation2 + $0x22] sm:$0xff]  ;;  %v546_v14 = vmul.f32 %v545_v12, %v1583_v2 }
 0x129   : > { %v645_v13 = vmul.f32 %v643_v8, %v1597_v11  ;;  %v547_v16 = vmul.f32 %v545_v12, %v1589_v6  ;;  %v659_v18 = vmul.f32 %v657_v15, %v1597_v11  ;;  %v566_v35 = vmul.f32 %v565_v28, %v1541_v37 }
 0x12a   : > { %v491_v51 = vmul.f32 %v489_v29, %v1565_v54  ;;  %v671_v28 = vstv %s1644_s16 }
 0x12c   : > { %578 = vrot.lane.b32.xlu1 %v573_v45, %s1274_s9  ;;  %478 = vrot.lane.b32.xlu0 %v474_v46, %s1275_s23 }
 0x130   : > { %480 = vrot.lane.b32.xlu1 %v475_v48, %s1275_s23  ;;  %590 = vrot.lane.b32.xlu0 %v586_v49, %s1275_s23 }
 0x134   : > { %592 = vrot.lane.b32.xlu1 %v587_v52, %s1275_s23  ;;  %500 = vrot.lane.b32.xlu0 %v496_v53, %s1274_s9 }
 0x138   : > { %502 = vrot.lane.b32.xlu1 %v497_v57, %s1274_s9  ;;  %612 = vrot.lane.b32.xlu0 %v608_v58, %s1274_s9 }
 0x13c   : > { %614 = vrot.lane.b32.xlu1 %v609_v61, %s1274_s9  ;;  %514 = vrot.lane.b32.xlu0 %v510_v62, %s1275_s23 }
 0x140   : > { %516 = vrot.lane.b32.xlu1 %v511_v0, %s1275_s23  ;;  %626 = vrot.lane.b32.xlu0 %v622_v1, %s1275_s23  ;;  %v637_v1 = vstv %s921_s22 }
 0x144   : > { %628 = vrot.lane.b32.xlu1 %v623_v4, %s1275_s23  ;;  %536 = vrot.lane.b32.xlu0 %v532_v5, %s1274_s9 }
 0x148   : > { %538 = vrot.lane.b32.xlu1 %v533_v9, %s1274_s9  ;;  %648 = vrot.lane.b32.xlu0 %v644_v10, %s1274_s9 }
 0x14c   : > { %650 = vrot.lane.b32.xlu1 %v645_v13, %s1274_s9  ;;  %550 = vrot.lane.b32.xlu0 %v546_v14, %s1275_s23  ;;  %s450_s9 = sld [smem:[#allocation10]]  ;;  %v638_v13 = vmul.f32 %v637_v1, %v1591_v7 }
 0x150   : > { %552 = vrot.lane.b32.xlu1 %v547_v16, %s1275_s23  ;;  %662 = vrot.lane.b32.xlu0 %v658_v17, %s1275_s23 }
 0x152   : > { %v453_v24 = vstv %s450_s9  ;;  %s1655_s9 = sld [smem:[#allocation14]] }
 0x153   : > { %v454_v27 = vmul.f32 %v453_v24, %v1539_v36  ;;  %v455_v34 = vmul.f32 %v453_v24, %v1546_v41  ;;  %v559_v24 = vstv %s1642_s21  ;;  %s1675_s21 = scalar_lea.hbm %s1732_s7, %s943_s19 }
 0x154   : > { %664 = vrot.lane.b32.xlu1 %v659_v18, %s1275_s23  ;;  %s1627_s23 = sld [smem:[#allocation10 + $0x7]] }
 0x15a   : > { %v601_v33 = vstv %s1627_s23  ;;  %s741_s23 = sshll.u32 %s1616_s12, 4  ;;  %s1677_s23 = int_to_ptr.vmem [resolvable:$true] %s741_s23 }
 0x15b   : > { %v602_v36 = vmul.f32 %v601_v33, %v1567_v55  ;;  %v603_v57 = vmul.f32 %v601_v33, %v1573_v59  ;;  %v525_v55 = vstv %s912_s20  ;;  %v701_v33 = vstv %s1648_s17  ;;  %s1179_s16 = scalar_lea.vmem %s1677_s23, 1024 }
 0x15c   : > { %v526_v54 = vmul.f32 %v525_v55, %v1583_v2  ;;  %v527_v59 = vmul.f32 %v525_v55, %v1589_v6  ;;  %v639_v2 = vmul.f32 %v637_v1, %v1597_v11  ;;  %p1180_p13 = scmp.ne.s32.totalorder %s1677_s23, %s1179_s16 }
 0x15e   : > { %p1181_p1 = pnand %p1180_p13, %p1754_p0 }
 0x160   : > { %p1182_p3 = pneg %p1181_p1 }
 0x196   : > { %v465_v23 = vpop.permute.xlu0 %464 }
 0x197   : > { %v470_v30 = vadd.f32 %v465_v23, %v454_v27 }
 0x19a   : > { %v467_v25 = vpop.permute.xlu1 %466  ;;  %v577_v26 = vpop.permute.xlu0 %576 }
 0x19b   : > { %v471_v40 = vadd.f32 %v467_v25, %v455_v34  ;;  %v582_v42 = vadd.f32 %v577_v26, %v566_v35  ;;  %v681_v35 = vstv %s1650_s29 }
 0x19e   : > { %v579_v31 = vpop.permute.xlu1 %578  ;;  %v479_v32 = vpop.permute.xlu0 %478 }
 0x19f   : > { %v484_v38 = vadd.f32 %v479_v32, %v470_v30  ;;  %v583_v41 = vadd.f32 %v579_v31, %v567_v47  ;;  %v675_v30 = vstv %s1646_s15  ;;  %s1276_s15 = smov [#allocation16]  }
 0x1a0   : > { %s1183_s17 = sshll.u32 %s1276_s15, 4  ;;  %s1184_s17 = int_to_ptr.vmem [resolvable:$false] %s1183_s17 }
 0x1a1   : > { %v492_v44 = vadd.f32 %v490_v39, %v484_v38  ;;  %v707_v38 = vstv %s1652_s10  ;;  %s1185_s29 = scalar_lea.vmem %s1184_s17, 2048  ;;  %p1186_p4 = scmp.lt.s32.totalorder %s1677_s23, %s1184_s17 }
 0x1a2   : > { %v481_v45 = vpop.permute.xlu1 %480  ;;  %v591_v46 = vpop.permute.xlu0 %590  ;;  %p1187_p8 = scmp.lt.s32.totalorder %s1185_s29, %s1179_s16 }
 0x1a3   : > { %v485_v48 = vadd.f32 %v481_v45, %v471_v40  ;;  %v596_v49 = vadd.f32 %v591_v46, %v582_v42 }
 0x1a4   : > { %p1188_p10 = por %p1187_p8, %p1186_p4 }
 0x1a5   : > { %v493_v52 = vadd.f32 %v491_v51, %v485_v48  ;;  %v604_v37 = vadd.f32 %v602_v36, %v596_v49  ;;  %v687_v48 = vstv %s1655_s9  ;;  %v713_v49 = vstv %s1657_s11 }
 0x1a6   : > { %v593_v53 = vpop.permute.xlu1 %592  ;;  %v501_v56 = vpop.permute.xlu0 %500  ;;  %p1189_p11 = pnand %p1188_p10, %p1182_p3 }
 0x1a7   : > { %v597_v50 = vadd.f32 %v593_v53, %v583_v41  ;;  %v506_v62 = vadd.f32 %v501_v56, %v492_v44 }
 0x1a9   : > { %v605_v58 = vadd.f32 %v603_v57, %v597_v50 }
 0x1aa   : > { %v503_v60 = vpop.permute.xlu1 %502  ;;  %v613_v61 = vpop.permute.xlu0 %612 }
 0x1ab   : > { %v507_v3 = vadd.f32 %v503_v60, %v493_v52  ;;  %v618_v4 = vadd.f32 %v613_v61, %v604_v37 }
 0x1ae   : > { %v615_v43 = vpop.permute.xlu1 %614  ;;  %v515_v63 = vpop.permute.xlu0 %514 }
 0x1af   : > { %v520_v0 = vadd.f32 %v515_v63, %v506_v62  ;;  %v619_v14 = vadd.f32 %v615_v43, %v605_v58 }
 0x1b1   : > { %v528_v5 = vadd.f32 %v526_v54, %v520_v0 }
 0x1b2   : > { %v517_v8 = vpop.permute.xlu1 %516  ;;  %v627_v9 = vpop.permute.xlu0 %626 }
 0x1b3   : > { %v521_v10 = vadd.f32 %v517_v8, %v507_v3  ;;  %v632_v12 = vadd.f32 %v627_v9, %v618_v4 }
 0x1b5   : > { %v529_v15 = vadd.f32 %v527_v59, %v521_v10  ;;  %v640_v16 = vadd.f32 %v638_v13, %v632_v12 }
 0x1b6   : > { %v629_v17 = vpop.permute.xlu1 %628  ;;  %v537_v18 = vpop.permute.xlu0 %536 }
 0x1b7   : > { %v633_v19 = vadd.f32 %v629_v17, %v619_v14  ;;  %v542_v6 = vadd.f32 %v537_v18, %v528_v5 }
 0x1b9   : > { %v641_v20 = vadd.f32 %v639_v2, %v633_v19 }
 0x1ba   : > { %v539_v21 = vpop.permute.xlu1 %538  ;;  %v649_v22 = vpop.permute.xlu0 %648 }
 0x1bb   : > { %v654_v25 = vadd.f32 %v649_v22, %v640_v16  ;;  %v543_v26 = vadd.f32 %v539_v21, %v529_v15 }
 0x1be   : > { %v651_v7 = vpop.permute.xlu1 %650  ;;  %v551_v11 = vpop.permute.xlu0 %550 }
 0x1bf   : > { %v556_v23 = vadd.f32 %v551_v11, %v542_v6  ;;  %v655_v40 = vadd.f32 %v651_v7, %v641_v20 }
 0x1c1   : > { %v560_v31 = vadd.f32 %v559_v24, %v556_v23 }
 0x1c2   : > { %v553_v27 = vpop.permute.xlu1 %552  ;;  %v663_v29 = vpop.permute.xlu0 %662 }
 0x1c3   : > { %v668_v32 = vadd.f32 %v663_v29, %v654_v25  ;;  %v557_v34 = vadd.f32 %v553_v27, %v543_v26  ;;  %v676_v44 = vmul.f32 %v675_v30, %v560_v31  ;;  %v702_v45 = vmul.f32 %v701_v33, %v560_v31 }
 0x1c5   : > { %v672_v39 = vadd.f32 %v671_v28, %v668_v32  ;;  %v561_v47 = vadd.f32 %v559_v24, %v557_v34 }
 0x1c6   : > { %v665_v42 = vpop.permute.xlu1 %664 }
 0x1c7   : > { %v682_v46 = vmul.f32 %v681_v35, %v672_v39  ;;  %v708_v36 = vmul.f32 %v707_v38, %v672_v39  ;;  %v669_v51 = vadd.f32 %v665_v42, %v655_v40  ;;  %v677_v50 = vmul.f32 %v675_v30, %v561_v47 }
 0x1c8   : > { %v703_v57 = vmul.f32 %v701_v33, %v561_v47 }
 0x1c9   : > { %v684_v41 = vadd.f32 %v682_v46, %v676_v44  ;;  %v710_v52 = vadd.f32 %v708_v36, %v702_v45  ;;  %v673_v37 = vadd.f32 %v671_v28, %v669_v51 }
 0x1cb   : > { %v688_v53 = vadd.f32 %v687_v48, %v684_v41  ;;  %v714_v56 = vadd.f32 %v713_v49, %v710_v52  ;;  %v683_v58 = vmul.f32 %v681_v35, %v673_v37  ;;  %v709_v60 = vmul.f32 %v707_v38, %v673_v37 }
 0x1cd   : > { %v690_v61 = vmax.f32 %v688_v53, 0.0  ;;  %v716_v55 = vmax.f32 %v714_v56, 0.0  ;;  %v685_v62 = vadd.f32 %v683_v58, %v677_v50  ;;  %v711_v43 = vadd.f32 %v709_v60, %v703_v57 }
 0x1cf   : > { %926 = vst.msk [vmem:[%s1616_s12 + $0x10] sm:$0xff] %vm693_vm3, %v690_v61  ;;  %931 = vst.msk [vmem:[%s1616_s12 + $0x30] sm:$0xff] %vm693_vm3, %v716_v55  ;;  %v689_v63 = vadd.f32 %v687_v48, %v685_v62  ;;  %v715_v0 = vadd.f32 %v713_v49, %v711_v43 }
 0x1d1   : > { %v691_v54 = vmax.f32 %v689_v63, 0.0  ;;  %v717_v1 = vmax.f32 %v715_v0, 0.0 }
 0x1d3   : > { %927 = vst.msk [vmem:[%s1616_s12 + $0x18] sm:$0xff] %vm693_vm3, %v691_v54  ;;  %932 = vst.msk [vmem:[%s1616_s12 + $0x38] sm:$0xff] %vm693_vm3, %v717_v1 }
 0x1d4   : > { %1192 = shalt.err (!%p1189_p11)
}
 0x1d5   : > { %s1193_s12 = scalar_lea.hbm %s1675_s21, 1024  ;;  %s1197_s11 = scalar_lea.hbm %s1732_s7, 2048 }
 0x1d6   : > { %p1194_p12 = scmp.ne.s32.totalorder %s1675_s21, %s1193_s12  ;;  %p1198_p7 = scmp.lt.u32.totalorder %s1675_s21, %s1732_s7 }
 0x1d7   : > { %p1199_p6 = scmp.lt.u32.totalorder %s1197_s11, %s1193_s12  ;;  %p1201_p13 = scmp.lt.u32.totalorder %s1193_s12, %s1675_s21 }
 0x1d8   : > { %p1195_p2 = pnand %p1194_p12, %p1754_p0 }
 0x1d9   : > { %p1200_p9 = por %p1199_p6, %p1198_p7 }
 0x1da   : > { %p1196_p5 = pneg %p1195_p2 }
 0x1db   : > { %p1202_p1 = por %p1201_p13, %p1200_p9 }
 0x1dd   : > { %p1203_p3 = pnand %p1202_p1, %p1196_p5 }
 0x1df   : > { %1206 = shalt.err (!%p1203_p3)
}
 0x1e0   : > { %s1277_s22 = smov 128   ;;  %s1278_s16 = smov 8  }
 0x1e1   : > { %970 = dma.vmem_to_hbm [thread:$0]  (%p1754_p0), %s1677_s23, 1024, %s1675_s21, %s728_s8, %s1277_s22, %s1277_s22, %s1278_s16  }
 0x1e2 PF: > { %s756_s15 = sand.u32 1, %s1249_s24   ;;  %p1755_p4 = scmp.ne.s32.totalorder %s1743_s14, 0 }
 0x1e3   : > { %p1756_p8 = scmp.ge.s32.totalorder %s1261_s27, 2  ;;  %s757_s17 = scalar_lea.sflag [#allocation5], %s756_s15 }
 0x1e5   : > { %p996_p10 = pnand %p1756_p8, %p1755_p4 }
 0x1e7   : > { %1244 = dma.done.wait (!%p996_p10), %s757_s17, 1024  }
 0x1e8   : > { %1246 = vsyncadd (!%p996_p10), %s757_s17, 4294966272  ;;  %p24_p11 = scmp.ge.s32.totalorder %s1422_s28, 4   ;;  %s1757_s24 = smov %s1253_s25 }
 0x1e9   : > { %s1758_s25 = smov %s1257_s26  ;;  %s1759_s26 = smov %s1433_s30 }
 0x1ea   : > { %s1760_s27 = smov %s1422_s28  ;;  %26 = sbr.rel (!%p24_p11) target bundleno = 9 (0x9), region = 125 }
 0x1f1   :  { %762 = vsyncpa [#allocation4], 1 }
 0x1f2   :  { %764 = vsyncpa [#allocation4 + $0x1], 1 }
 0x1f3   :  { %765 = vsyncpa [#allocation5], 1 }
 0x1f4   :  { %767 = vsyncpa [#allocation5 + $0x1], 1 }
 0x1f5   :  { %768 = vsyncpa [#allocation6], 1 }
 0x1f6   :  { %770 = vsyncpa [#allocation6 + $0x1], 1 }
 0x1f7   :  { %771 = vsyncpa [#allocation9], 1 }
 0x1f8   :  { %772 = vsyncpa [#allocation12], 1 }
 0x1f9   :  { %773 = vsyncpa [#allocation15], 1 }

</bundles_post_ra>
